<compile_context>
chip_gen: v7x
topology: tpu7x:2x2x1
jax: 0.10.0
libtpu: 0.0.40
codegen_flags: <defaults>
</compile_context>

<pallas_src>
import functools

import jax
import jax.numpy as jnp
import numpy as np
from jax.experimental import pallas as pl
from jax.experimental.pallas import tpu as pltpu


# ----------------------------------------------------------------------------
# Generation-aware VMEM budgeting
# ----------------------------------------------------------------------------
def _physical_vmem_bytes():
    cap = 64 * 1024 * 1024  # conservative fallback (v7x per-TC size)
    try:
        info = pltpu.get_tpu_info()
        cap = int(getattr(info, "vmem_capacity_bytes", cap)) or cap
    except Exception:
        pass
    return cap


def _vmem_budget_bytes():
    # ~1/3 of physical VMEM for the kernel working set (v7x ~21 MiB, v5e/v6e ~42 MiB),
    # leaving room for compiler scratch / pipelining.
    cap = _physical_vmem_bytes()
    return max(16 * 1024 * 1024, min(cap // 3, 48 * 1024 * 1024))


def _vmem_limit_bytes(footprint):
    cap = _physical_vmem_bytes()
    want = max(32 * 1024 * 1024, int(footprint) + 16 * 1024 * 1024)
    return int(min(cap * 3 // 4, want))


# ----------------------------------------------------------------------------
# Tiling helpers
# ----------------------------------------------------------------------------
def _largest_divisor_leq(n, cap):
    cap = max(1, min(n, cap))
    for d in range(cap, 0, -1):
        if n % d == 0:
            return d
    return 1


def _choose_feature_tile(F, max_tf, fits):
    """Pick a lane-dense feature tile TF and padded extent Fp (multiple of TF).

    fits(tf) -> bool: does one Bt=1 grid step with tile `tf` fit the VMEM budget.
    Prefers (a) the full extent when small, (b) a large 128-aligned divisor of F
    (no padding), (c) padding F up to a multiple of a large 128-aligned tile.
    """
    if F <= max_tf and fits(F):
        return F, F
    t = min(max_tf, F)
    t = max(128, (t // 128) * 128)
    while t > 128 and not fits(t):
        t -= 128
    # prefer an exact divisor of F at >= half the budgeted tile (avoids padding)
    d = t
    while d >= max(128, t // 2):
        if F % d == 0:
            return d, F
        d -= 128
    Fp = -(-F // t) * t
    return t, Fp


# ----------------------------------------------------------------------------
# Kernel 1: fused Linear + LayerNorm (eps = 1e-12)
#   bf16 MXU matmul (f32 accumulate); two-pass variance in f32; resident weights.
# ----------------------------------------------------------------------------
def linear_ln_kernel(x_ref, w_ref, b_ref, gamma_ref, beta_ref, o_ref):
    x = x_ref[...].astype(jnp.bfloat16)                   # (tm, Din) -> bf16 for MXU
    w = w_ref[...]                                        # (Din, Dout) bf16, resident
    y = jnp.dot(x, w, preferred_element_type=jnp.float32) + b_ref[...]
    mu = jnp.mean(y, axis=-1, keepdims=True)
    d = y - mu
    var = jnp.mean(d * d, axis=-1, keepdims=True)         # two-pass: robust vs E[y^2]-mu^2
    yn = d * jax.lax.rsqrt(var + 1e-12)
    o_ref[...] = (yn * gamma_ref[...] + beta_ref[...]).astype(o_ref.dtype)


def linear_layernorm(x, w, b, gamma, beta, *, max_rows=1024, out_dtype=jnp.float32):
    """LayerNorm(x @ w + b); x may have arbitrary leading dims (glue reshapes)."""
    lead = x.shape[:-1]
    din = x.shape[-1]
    dout = w.shape[1]
    x2 = x.reshape(-1, din)
    N = x2.shape[0]

    budget = _vmem_budget_bytes()
    w_bytes = din * dout * 2                                   # resident bf16 weight
    # per-row bytes: double-buffered x + out blocks, plus in-kernel f32 temporaries
    per_row = 2 * (din * x2.dtype.itemsize
                   + dout * jnp.dtype(out_dtype).itemsize) + 2 * 4 * dout
    row_cap = max(8, (budget - w_bytes) // max(per_row, 1))
    tm = min(max_rows, int(row_cap), N)
    if tm < N:
        tm = max(8, (tm // 8) * 8)
        Np = -(-N // tm) * tm
    else:
        Np = N
    if Np != N:
        x2 = jnp.pad(x2, ((0, Np - N), (0, 0)))

    wb = w.astype(jnp.bfloat16)
    footprint = w_bytes + tm * per_row + 8 * 4 * dout
    out = pl.pallas_call(
        linear_ln_kernel,
        out_shape=jax.ShapeDtypeStruct((Np, dout), out_dtype),
        grid=(Np // tm,),
        in_specs=[
            pl.BlockSpec((tm, din), lambda i: (i, 0)),
            pl.BlockSpec((din, dout), lambda i: (0, 0)),       # resident weight
            pl.BlockSpec((1, dout), lambda i: (0, 0)),
            pl.BlockSpec((1, dout), lambda i: (0, 0)),
            pl.BlockSpec((1, dout), lambda i: (0, 0)),
        ],
        out_specs=pl.BlockSpec((tm, dout), lambda i: (i, 0)),
        compiler_params=pltpu.CompilerParams(
            dimension_semantics=("parallel",),
            vmem_limit_bytes=_vmem_limit_bytes(footprint)),
    )(x2, wb,
      b.reshape(1, dout).astype(jnp.float32),
      gamma.reshape(1, dout).astype(jnp.float32),
      beta.reshape(1, dout).astype(jnp.float32))
    if Np != N:
        out = out[:N]
    return out.reshape(*lead, dout)


# ----------------------------------------------------------------------------
# Kernel 2: Selector core
#   block of Bt batch elements x one lane-dense F-tile per grid step:
#     logits = sum_h K*Q ; p = softmax(logits)
#     for all T draws at once: mask = softmax((p + gumbel)/tau)
#     out_tile = mask @ V_tile   (batched dot_general; V streamed bf16, upcast f32)
# ----------------------------------------------------------------------------
def selector_kernel(q_ref, k_ref, v_ref, g_ref, o_ref, *, tau):
    q = q_ref[...].astype(jnp.float32)                    # (Bt, 1, H)
    k = k_ref[...].astype(jnp.float32)                    # (Bt, n, H)
    g = g_ref[...]                                        # (Bt, T, n) f32
    v = v_ref[...].astype(jnp.float32)                    # (Bt, n, TF), bf16 -> f32

    # logits[b, i] = sum_h K[b,i,h] * Q[b,h]  (VPU multiply + lane reduce; MXU stays free)
    logits = jnp.sum(k * q, axis=-1)                      # (Bt, n)
    m = jnp.max(logits, axis=-1, keepdims=True)
    e = jnp.exp(logits - m)
    p = e / jnp.sum(e, axis=-1, keepdims=True)            # softmax over n, (Bt, n)

    # F.gumbel_softmax(probs-as-logits, tau, hard=False), all T draws at once
    h = (g + p[:, None, :]) / tau                         # (Bt, T, n)
    hm = jnp.max(h, axis=-1, keepdims=True)
    eh = jnp.exp(h - hm)
    mask = eh / jnp.sum(eh, axis=-1, keepdims=True)       # (Bt, T, n)

    out = jax.lax.dot_general(mask, v, (((2,), (1,)), ((0,), (0,))),
                              preferred_element_type=jnp.float32)
    o_ref[...] = out.astype(o_ref.dtype)


def selector_core(Qn, Kn, V, gumbel, tau, *,
                  max_tf=8192, max_bt=8, out_dtype=jnp.float32, vmem_budget=None):
    B, H = Qn.shape
    _, n, F = V.shape
    T = gumbel.shape[1]
    if vmem_budget is None:
        vmem_budget = _vmem_budget_bytes()

    Vb = V.astype(jnp.bfloat16)                           # stream dominant operand at half width
    out_bytes = jnp.dtype(out_dtype).itemsize

    # per-batch-element VMEM footprint for one grid step with feature tile `tf`
    def per_b(tf):
        return (2 * 4 * (H + n * H + T * n)               # Q / K / g f32 blocks, double-buffered
                + 2 * 2 * n * tf                          # V block (bf16), double-buffered
                + 4 * n * tf                              # in-kernel f32 upcast of the V tile
                + 2 * out_bytes * T * tf                  # out block, double-buffered
                + 4 * T * tf                              # f32 dot accumulator / intermediate
                + 8 * T * n)                              # mask + misc small temporaries

    TF, Fp = _choose_feature_tile(F, max_tf, lambda tf: per_b(tf) <= vmem_budget)
    if Fp != F:
        Vb = jnp.pad(Vb, ((0, 0), (0, 0), (0, Fp - F)))   # zero-pad: padded out cols are sliced off

    pb = per_b(TF)
    Bt = _largest_divisor_leq(B, max(1, min(max_bt, vmem_budget // max(pb, 1))))

    Q3 = Qn.reshape(B, 1, H).astype(jnp.float32)          # leading dims: no (8,128) constraint
    K3 = Kn.astype(jnp.float32)
    grid = (B // Bt, Fp // TF)                            # F innermost: Q/K/g blocks revisited, not re-fetched

    out = pl.pallas_call(
        functools.partial(selector_kernel, tau=tau),
        out_shape=jax.ShapeDtypeStruct((B, T, Fp), out_dtype),
        grid=grid,
        in_specs=[
            pl.BlockSpec((Bt, 1, H), lambda b, f: (b, 0, 0)),
            pl.BlockSpec((Bt, n, H), lambda b, f: (b, 0, 0)),
            pl.BlockSpec((Bt, n, TF), lambda b, f: (b, 0, f)),
            pl.BlockSpec((Bt, T, n), lambda b, f: (b, 0, 0)),
        ],
        out_specs=pl.BlockSpec((Bt, T, TF), lambda b, f: (b, 0, f)),
        compiler_params=pltpu.CompilerParams(
            dimension_semantics=("parallel", "parallel"),
            vmem_limit_bytes=_vmem_limit_bytes(Bt * pb)),
    )(Q3, K3, Vb, gumbel.astype(jnp.float32))
    if Fp != F:
        out = out[..., :F]
    return out


# ----------------------------------------------------------------------------
# Parameter init (deterministic, synthetic)
# ----------------------------------------------------------------------------
def init_selector_params(key, q_dim, dim):
    ks = jax.random.split(key, 6)
    s = 0.05
    return {
        "wq": jax.random.normal(ks[0], (q_dim, dim), jnp.float32) * s,
        "bq": jax.random.normal(ks[1], (dim,), jnp.float32) * 0.01,
        "gq": 1.0 + jax.random.normal(ks[2], (dim,), jnp.float32) * 0.01,
        "betaq": jnp.zeros((dim,), jnp.float32),
        "wk": jax.random.normal(ks[3], (dim, dim), jnp.float32) * s,
        "bk": jax.random.normal(ks[4], (dim,), jnp.float32) * 0.01,
        "gk": 1.0 + jax.random.normal(ks[5], (dim,), jnp.float32) * 0.01,
        "betak": jnp.zeros((dim,), jnp.float32),
    }


# ----------------------------------------------------------------------------
# Full MySelector3 forward (default hdim == dim path), Pallas version
# ----------------------------------------------------------------------------
def myselector3_forward(seg_p, reg_p, q_feat, image_embeds, video_cls,
                        g_seg, g_reg, *, topk, topj, tau, return_intermediates=False):
    bz, numc, numf_pc, nump, dim = image_embeds.shape
    hdim = seg_p["wk"].shape[1]
    assert hdim == dim, "default MySelector3 config: hdim == dim -> proj layers skipped"

    # video_o prep
    video_feat = image_embeds.reshape(bz, numc * numf_pc, nump, dim)
    video_cls_norm = video_cls / jnp.linalg.norm(video_cls, axis=-1, keepdims=True)
    seg_feat = jnp.mean(video_cls_norm.reshape(bz, numc, numf_pc, dim), axis=-2)  # (bz, numc, dim)

    q = q_feat[..., 0]                                     # (bz, qdim) -- Q.squeeze(-1)

    # ---- seg_selector (Selector, topk, tau) ----
    Qs = linear_layernorm(q, seg_p["wq"], seg_p["bq"], seg_p["gq"], seg_p["betaq"])
    Ks = linear_layernorm(seg_feat, seg_p["wk"], seg_p["bk"], seg_p["gk"], seg_p["betak"])
    Vflat = video_feat.reshape(bz, numc, numf_pc * nump * dim)
    sel = selector_core(Qs, Ks, Vflat, g_seg, tau)         # (bz, topk, numf_pc*nump*dim)
    selected_segs = sel.reshape(bz, topk * numf_pc, nump, dim)  # == torch.cat(..., dim=1)

    # ---- reg_selector (Selector, topj, tau) ----
    B2 = bz * topk * numf_pc
    q_rep = jnp.broadcast_to(q[:, None, :], (bz, topk * numf_pc, q.shape[-1])).reshape(B2, -1)
    patches = selected_segs.reshape(B2, nump, dim)
    Qr = linear_layernorm(q_rep, reg_p["wq"], reg_p["bq"], reg_p["gq"], reg_p["betaq"])
    Kr = linear_layernorm(patches, reg_p["wk"], reg_p["bk"], reg_p["gk"], reg_p["betak"])
    sel_patches = selector_core(Qr, Kr, patches, g_reg, tau)   # (B2, topj, dim)

    video_embedds = sel_patches.reshape(bz, 1, topk * numf_pc, topj, dim)
    if return_intermediates:
        mid = dict(q=q, seg_feat=seg_feat, Qs=Qs, Ks=Ks, Vflat=Vflat, sel=sel,
                   q_rep=q_rep, patches=patches, Qr=Qr, Kr=Kr, sel_patches=sel_patches)
        return video_embedds, mid
    return video_embedds


# ----------------------------------------------------------------------------
# Pure-JAX references (same math, same intentional bf16 casts) for stage checks
# ----------------------------------------------------------------------------
def _linear_ln_ref(x, w, b, gamma, beta):
    y = jnp.dot(x.astype(jnp.bfloat16), w.astype(jnp.bfloat16),
                preferred_element_type=jnp.float32) + b
    mu = y.mean(-1, keepdims=True)
    var = ((y - mu) ** 2).mean(-1, keepdims=True)
    return (y - mu) / jnp.sqrt(var + 1e-12) * gamma + beta


def _selector_ref(Qn, Kn, V, g, tau):
    hp = jax.lax.Precision.HIGHEST
    v = V.astype(jnp.bfloat16).astype(jnp.float32)         # mirror the bf16 V stream
    logits = jnp.einsum("bnh,bh->bn", Kn.astype(jnp.float32), Qn.astype(jnp.float32),
                        precision=hp)
    p = jax.nn.softmax(logits, axis=-1)
    mask = jax.nn.softmax((g.astype(jnp.float32) + p[:, None, :]) / tau, axis=-1)
    return jnp.einsum("btn,bnf->btf", mask, v, precision=hp)


# ----------------------------------------------------------------------------
if __name__ == "__main__":
    key = jax.random.PRNGKey(0)

    # small shapes consistent with MySelector3 (dim == hdim default path)
    bz, numc, numf_pc, nump = 2, 2, 2, 8      # numf (frames) = numc * numf_pc = 4
    dim = hdim = 32
    qdim = 16
    topk, topj = 2, 4                          # module defaults are topk=2, topj=128
    tau = 1e-6

    keys = jax.random.split(key, 8)
    image_embeds = jax.random.normal(keys[0], (bz, numc, numf_pc, nump, dim), jnp.float32)
    video_cls = jax.random.normal(keys[1], (bz, numc * numf_pc, dim), jnp.float32)
    qf = jax.random.normal(keys[2], (bz, qdim), jnp.float32)
    q_feat = (qf / jnp.linalg.norm(qf, axis=-1, keepdims=True))[..., None]  # (bz, qdim, 1)

    B2 = bz * topk * numf_pc
    g_seg = jax.random.gumbel(keys[3], (bz, topk, numc), jnp.float32)
    g_reg = jax.random.gumbel(keys[4], (B2, topj, nump), jnp.float32)

    seg_params = init_selector_params(keys[5], qdim, hdim)
    reg_params = init_selector_params(keys[6], qdim, hdim)

    out, mid = myselector3_forward(
        seg_params, reg_params, q_feat, image_embeds, video_cls, g_seg, g_reg,
        topk=topk, topj=topj, tau=tau, return_intermediates=True,
    )
    out = jax.block_until_ready(out)

    assert out.shape == (bz, 1, topk * numf_pc, topj, dim), out.shape
    assert bool(jnp.all(jnp.isfinite(out)))

    # Stage-wise correctness vs pure-JAX references. Each stage is checked on the
    # exact inputs the Pallas kernels saw, so the intentional bf16 casts round
    # identically in kernel and reference (tau=1e-6 makes the gumbel-softmax an
    # effective argmax, which would amplify any input mismatch end-to-end).
    tol = dict(rtol=5e-3, atol=5e-3)
    chk = np.testing.assert_allclose
    sp, rp = seg_params, reg_params
    chk(np.asarray(mid["Qs"]),
        np.asarray(_linear_ln_ref(mid["q"], sp["wq"], sp["bq"], sp["gq"], sp["betaq"])), **tol)
    chk(np.asarray(mid["Ks"]),
        np.asarray(_linear_ln_ref(mid["seg_feat"], sp["wk"], sp["bk"], sp["gk"], sp["betak"])), **tol)
    chk(np.asarray(mid["sel"]),
        np.asarray(_selector_ref(mid["Qs"], mid["Ks"], mid["Vflat"], g_seg, tau)), **tol)
    chk(np.asarray(mid["Qr"]),
        np.asarray(_linear_ln_ref(mid["q_rep"], rp["wq"], rp["bq"], rp["gq"], rp["betaq"])), **tol)
    chk(np.asarray(mid["Kr"]),
        np.asarray(_linear_ln_ref(mid["patches"], rp["wk"], rp["bk"], rp["gk"], rp["betak"])), **tol)
    chk(np.asarray(mid["sel_patches"]),
        np.asarray(_selector_ref(mid["Qr"], mid["Kr"], mid["patches"], g_reg, tau)), **tol)

    print("KERNEL_OK")
</pallas_src>

<mosaic_0001>
module attributes {stable_mosaic.version = 11 : i64} {
  func.func @linear_ln_kernel(%arg0: i32, %arg1: memref<2x16xf32, #tpu.memory_space<vmem>>, %arg2: memref<16x32xbf16, #tpu.memory_space<vmem>>, %arg3: memref<1x32xf32, #tpu.memory_space<vmem>>, %arg4: memref<1x32xf32, #tpu.memory_space<vmem>>, %arg5: memref<1x32xf32, #tpu.memory_space<vmem>>, %arg6: memref<2x32xf32, #tpu.memory_space<vmem>>) attributes {dimension_semantics = [#tpu.dimension_semantics<parallel>], iteration_bounds = array<i64: 1>, scalar_prefetch = 0 : i64, scratch_operands = 0 : i64, tpu.core_type = #tpu.core_type<tc>, window_params = [{transform_indices = @transform_0, window_bounds = array<i64: 2, 16>}, {pipeline_mode = #tpu.pipeline_mode<synchronous>, transform_indices = @transform_1, window_bounds = array<i64: 16, 32>}, {pipeline_mode = #tpu.pipeline_mode<synchronous>, transform_indices = @transform_2, window_bounds = array<i64: 1, 32>}, {pipeline_mode = #tpu.pipeline_mode<synchronous>, transform_indices = @transform_3, window_bounds = array<i64: 1, 32>}, {pipeline_mode = #tpu.pipeline_mode<synchronous>, transform_indices = @transform_4, window_bounds = array<i64: 1, 32>}, {transform_indices = @transform_5, window_bounds = array<i64: 2, 32>}]} {
    %c0 = arith.constant 0 : index
    %c0_0 = arith.constant 0 : index
    %0 = vector.load %arg1[%c0, %c0_0] : memref<2x16xf32, #tpu.memory_space<vmem>>, vector<2x16xf32>
    %1 = arith.truncf %0 : vector<2x16xf32> to vector<2x16xbf16>
    %c0_1 = arith.constant 0 : index
    %c0_2 = arith.constant 0 : index
    %2 = vector.load %arg2[%c0_1, %c0_2] : memref<16x32xbf16, #tpu.memory_space<vmem>>, vector<16x32xbf16>
    %cst = arith.constant dense<0.000000e+00> : vector<2x32xf32>
    %3 = tpu.matmul %1, %2, %cst {dimension_numbers = #tpu.dot_dimension_numbers<[1], [0], [0], [1], [0, 0, 1, 1], [], []>} : vector<2x16xbf16>, vector<16x32xbf16>, vector<2x32xf32> -> vector<2x32xf32>
    %c0_3 = arith.constant 0 : index
    %c0_4 = arith.constant 0 : index
    %4 = vector.load %arg3[%c0_3, %c0_4] : memref<1x32xf32, #tpu.memory_space<vmem>>, vector<1x32xf32>
    %5 = vector.broadcast %4 : vector<1x32xf32> to vector<2x32xf32>
    %6 = arith.addf %3, %5 : vector<2x32xf32>
    %cst_5 = arith.constant dense<0.000000e+00> : vector<2xf32>
    %7 = vector.multi_reduction <add>, %6, %cst_5 [1] : vector<2x32xf32> to vector<2xf32>
    %8 = vector.shape_cast %7 : vector<2xf32> to vector<2x1xf32>
    %cst_6 = arith.constant 3.200000e+01 : f32
    %9 = vector.broadcast %cst_6 : f32 to vector<2x1xf32>
    %10 = arith.divf %8, %9 : vector<2x1xf32>
    %11 = vector.broadcast %10 : vector<2x1xf32> to vector<2x32xf32>
    %12 = arith.subf %6, %11 : vector<2x32xf32>
    %13 = arith.mulf %12, %12 : vector<2x32xf32>
    %cst_7 = arith.constant dense<0.000000e+00> : vector<2xf32>
    %14 = vector.multi_reduction <add>, %13, %cst_7 [1] : vector<2x32xf32> to vector<2xf32>
    %15 = vector.shape_cast %14 : vector<2xf32> to vector<2x1xf32>
    %cst_8 = arith.constant 3.200000e+01 : f32
    %16 = vector.broadcast %cst_8 : f32 to vector<2x1xf32>
    %17 = arith.divf %15, %16 : vector<2x1xf32>
    %cst_9 = arith.constant 9.99999996E-13 : f32
    %18 = vector.broadcast %cst_9 : f32 to vector<2x1xf32>
    %19 = arith.addf %17, %18 : vector<2x1xf32>
    %20 = math.rsqrt %19 : vector<2x1xf32>
    %21 = vector.broadcast %20 : vector<2x1xf32> to vector<2x32xf32>
    %22 = arith.mulf %12, %21 : vector<2x32xf32>
    %c0_10 = arith.constant 0 : index
    %c0_11 = arith.constant 0 : index
    %23 = vector.load %arg4[%c0_10, %c0_11] : memref<1x32xf32, #tpu.memory_space<vmem>>, vector<1x32xf32>
    %24 = vector.broadcast %23 : vector<1x32xf32> to vector<2x32xf32>
    %25 = arith.mulf %22, %24 : vector<2x32xf32>
    %c0_12 = arith.constant 0 : index
    %c0_13 = arith.constant 0 : index
    %26 = vector.load %arg5[%c0_12, %c0_13] : memref<1x32xf32, #tpu.memory_space<vmem>>, vector<1x32xf32>
    %27 = vector.broadcast %26 : vector<1x32xf32> to vector<2x32xf32>
    %28 = arith.addf %25, %27 : vector<2x32xf32>
    %c0_14 = arith.constant 0 : index
    %c0_15 = arith.constant 0 : index
    %29 = vector.load %arg6[%c0_14, %c0_15] : memref<2x32xf32, #tpu.memory_space<vmem>>, vector<2x32xf32>
    tpu.vector_store %arg6[%c0_14, %c0_15], %28 {strides = array<i32>} : memref<2x32xf32, #tpu.memory_space<vmem>>, vector<2x32xf32>,
    return
  }
  func.func @transform_0(%arg0: i32) -> (i32, i32) {
    %c0_i32 = arith.constant 0 : i32
    %c0_i32_0 = arith.constant 0 : i32
    return %arg0, %c0_i32 : i32, i32
  }
  func.func @transform_1(%arg0: i32) -> (i32, i32) {
    %c0_i32 = arith.constant 0 : i32
    %c0_i32_0 = arith.constant 0 : i32
    %c0_i32_1 = arith.constant 0 : i32
    return %c0_i32, %c0_i32_0 : i32, i32
  }
  func.func @transform_2(%arg0: i32) -> (i32, i32) {
    %c0_i32 = arith.constant 0 : i32
    %c0_i32_0 = arith.constant 0 : i32
    %c0_i32_1 = arith.constant 0 : i32
    return %c0_i32, %c0_i32_0 : i32, i32
  }
  func.func @transform_3(%arg0: i32) -> (i32, i32) {
    %c0_i32 = arith.constant 0 : i32
    %c0_i32_0 = arith.constant 0 : i32
    %c0_i32_1 = arith.constant 0 : i32
    return %c0_i32, %c0_i32_0 : i32, i32
  }
  func.func @transform_4(%arg0: i32) -> (i32, i32) {
    %c0_i32 = arith.constant 0 : i32
    %c0_i32_0 = arith.constant 0 : i32
    %c0_i32_1 = arith.constant 0 : i32
    return %c0_i32, %c0_i32_0 : i32, i32
  }
  func.func @transform_5(%arg0: i32) -> (i32, i32) {
    %c0_i32 = arith.constant 0 : i32
    %c0_i32_0 = arith.constant 0 : i32
    return %arg0, %c0_i32 : i32, i32
  }
}

</mosaic_0001>

<bundles_post_ra>
// kernel: tpu_custom_call.1
= control target key start
LH: loop header
LB: loop body
LE: loop exit
PB: predicated region body
PF: predicated region fallthrough
CT: control target
= control target key end

     0   :  { %10 = vsyncpa [#allocation3], 0  ;;  %s344_s0 = inlined_call_operand.hbm [shape: f32[2,16], index: 0, kind: input, shape index: {}]   ;;  %s345_s1 = inlined_call_operand.hbm [shape: bf16[16,32], index: 1, kind: input, shape index: {}]   ;;  %s346_s2 = inlined_call_operand.vmem [shape: f32[1,32], index: 2, kind: input, shape index: {}]   ;;  %s347_s3 = inlined_call_operand.vmem [shape: f32[1,32], index: 3, kind: input, shape index: {}]   ;;  %s348_s4 = inlined_call_operand.vmem [shape: f32[1,32], index: 4, kind: input, shape index: {}]   ;;  %s349_s5 = inlined_call_operand.hbm [shape: f32[2,32], index: 5, kind: output, shape index: {}]  }
   0x1   :  { %11 = vsyncpa [#allocation6], 0 }
   0x2   :  { %12 = vsyncpa [#allocation4], 0  ;;  %s252_s18 = smov [#allocation2]   ;;  %s253_s20 = smov [#allocation5]  }
   0x3   :  { %s19_s19 = sshll.u32 %s252_s18, 4  ;;  %s28_s21 = sshll.u32 %s253_s20, 4  ;;  %s20_s19 = int_to_ptr.vmem [resolvable:$true] %s19_s19  ;;  %s289_s21 = int_to_ptr.vmem [resolvable:$true] %s28_s21 }
   0x4   :  { %s180_s24 = scalar_lea.hbm %s344_s0, 32 }
   0x5   :  { %p181_p0 = scmp.ne.s32.totalorder %s344_s0, %s180_s24  ;;  %p184_p1 = scmp.lt.u32.totalorder %s180_s24, %s344_s0 }
   0x7   :  { %p186_p2 = pnand %p184_p1, %p181_p0 }
   0x9   :  { %189 = shalt.err (!%p186_p2)
}
   0xa   :  { %s190_s29 = scalar_lea.vmem %s20_s19, 32  ;;  %p195_p4 = scmp.lt.s32.totalorder %s20_s19, %s20_s19 }
   0xb   :  { %p191_p3 = scmp.ne.s32.totalorder %s20_s19, %s190_s29  ;;  %p196_p5 = scmp.lt.s32.totalorder %s190_s29, %s190_s29 }
   0xd   :  { %p197_p6 = por %p196_p5, %p195_p4 }
   0xf   :  { %p198_p7 = pnand %p197_p6, %p191_p3 }
  0x11   :  { %201 = shalt.err (!%p198_p7)
}
  0x12   :  { %22 = dma.hbm_to_vmem [thread:$0]  %s344_s0, 32, %s20_s19, [#allocation3]  }
  0x13   :  { %s202_s9 = scalar_lea.hbm %s345_s1, 128 }
  0x14   :  { %p203_p8 = scmp.ne.s32.totalorder %s345_s1, %s202_s9  ;;  %p206_p9 = scmp.lt.u32.totalorder %s202_s9, %s345_s1 }
  0x16   :  { %p208_p10 = pnand %p206_p9, %p203_p8 }
  0x18   :  { %211 = shalt.err (!%p208_p10)
}
  0x19   :  { %s212_s14 = scalar_lea.vmem %s289_s21, 128  ;;  %p217_p12 = scmp.lt.s32.totalorder %s289_s21, %s289_s21 }
  0x1a   :  { %p213_p11 = scmp.ne.s32.totalorder %s289_s21, %s212_s14  ;;  %p218_p13 = scmp.lt.s32.totalorder %s212_s14, %s212_s14 }
  0x1c   :  { %p219_p0 = por %p218_p13, %p217_p12 }
  0x1e   :  { %p220_p1 = pnand %p219_p0, %p213_p11 }
  0x20   :  { %223 = shalt.err (!%p220_p1)
}
  0x21   :  { %s254_s0 = smov 64   ;;  %s255_s15 = smov 4  }
  0x22   :  { %34 = dma.hbm_to_vmem [thread:$0]  %s345_s1, 128, %s289_s21, [#allocation6], %s254_s0, %s254_s0, %s255_s15  }
  0x23   :  { %246 = dma.done.wait [#allocation3], 32  }
  0x24   :  { %247 = vsyncadd [#allocation3], 4294967264 }
  0x25   :  { %248 = dma.done.wait [#allocation6], 128  }
  0x26   :  { %249 = vsyncadd [#allocation6], 4294967168  ;;  %v256_v0 = vmov 0.0   ;;  %vm257_vm0 = vmmov 0   ;;  %v177_v1 = vld [vmem:[#allocation5] sm:$0xff]   ;;  %vm65_vm1 = vcmask 130048  }
  0x27   :  { %164 = vmatprep.subr.bf16.mxu0 %v256_v0  ;;  %166 = vmatprep.mubr.msk.bf16.mxu0 %vm257_vm0, %v256_v0  ;;  %v48_v2 = vld [vmem:[#allocation2] sm:$0x3]  ;;  %vm109_vm2 = vcmask 254976   ;;  %s258_s22 = smov [#allocation7]  }
  0x28   :  { %165 = vmatpush3.bf16.msra.mxu0 %v177_v1  ;;  %v49_v3 = vpack.c.bf16 %v48_v2, %v48_v2  ;;  %v157_v4 = vld [vmem:[%s346_s2] ss:$0 sm:$0xff]  ;;  %s147_s23 = sshll.u32 %s258_s22, 4  ;;  %s148_s23 = int_to_ptr.vmem [resolvable:$true] %s147_s23 }
  0x29   :  { %v160_v20 = vld [vmem:[%s347_s3] ss:$0 sm:$0xff]  ;;  %s224_s24 = scalar_lea.vmem %s148_s23, 32  ;;  %p229_p3 = scmp.lt.s32.totalorder %s148_s23, %s148_s23 }
  0x2a   :  { %v161_v22 = vld [vmem:[%s348_s4] ss:$0 sm:$0xff]  ;;  %p225_p2 = scmp.ne.s32.totalorder %s148_s23, %s224_s24  ;;  %p230_p4 = scmp.lt.s32.totalorder %s224_s24, %s224_s24 }
  0x2b   :  { %167 = vmatmul.mubr.msk.bf16.vlgmr.msra.gmra.mrb[0].mxu0 %vm65_vm1, %v49_v3 }
  0x2c   :  { %p231_p5 = por %p230_p4, %p229_p3 }
  0x2e   :  { %p232_p6 = pnand %p231_p5, %p225_p2 }
  0xfe   :  { %v103_v5 = vpop.f32.mrb[0].mxu0 }
  0xff   :  { %v104_v6 = vadd.f32 %v157_v4, %v103_v5  ;;  %v168_v7 = vpop.f32.mrb[1].mxu0 }
 0x100   :  { %v106_v8 = vpop.f32.mrb[2].mxu0 }
 0x101   :  { %v169_v9 = vpop.f32.mrb[3].mxu0  ;;  %v110_v10 = vsel %vm109_vm2, %v104_v6, 0.0 }
 0x102   :  { %111 = vadd.xlane.f32.xlu0 %v110_v10 }
 0x18f   :  { %v112_v11 = vpop.xlane.xlu0 %111 }
 0x190   :  { %v114_v12 = vmul.f32 0.03125, %v112_v11 }
 0x192   :  { %v115_v13 = vsub.f32 %v104_v6, %v114_v12 }
 0x194   :  { %v116_v14 = vmul.f32 %v115_v13, %v115_v13 }
 0x196   :  { %v117_v15 = vsel %vm109_vm2, %v116_v14, 0.0 }
 0x197   :  { %118 = vadd.xlane.f32.xlu0 %v117_v15 }
 0x224   :  { %v119_v16 = vpop.xlane.xlu0 %118 }
 0x225   :  { %v120_v17 = vmul.f32 0.03125, %v119_v16 }
 0x227   :  { %v121_v18 = vadd.f32 1e-12, %v120_v17 }
 0x229   :  { %178 = vrsqrt.f32 %v121_v18 }
 0x233   :  { %v179_v19 = vpop.eup %178 }
 0x234   :  { %v123_v21 = vmul.f32 %v179_v19, %v115_v13 }
 0x236   :  { %v131_v23 = vmul.f32 %v160_v20, %v123_v21 }
 0x238   :  { %v139_v24 = vadd.f32 %v161_v22, %v131_v23 }
 0x23a   :  { %140 = vst.msk [vmem:[#allocation7] sm:$0x3] %vm109_vm2, %v139_v24 }
 0x23b   :  { %235 = shalt.err (!%p232_p6)
}
 0x23c   :  { %s236_s26 = scalar_lea.hbm %s349_s5, 32 }
 0x23d   :  { %p237_p7 = scmp.ne.s32.totalorder %s349_s5, %s236_s26  ;;  %p240_p8 = scmp.lt.u32.totalorder %s236_s26, %s349_s5 }
 0x23f   :  { %p242_p9 = pnand %p240_p8, %p237_p7 }
 0x241   :  { %245 = shalt.err (!%p242_p9)
}
 0x242   :  { %150 = dma.vmem_to_hbm [thread:$0]  %s148_s23, 32, %s349_s5, [#allocation4]  }
 0x243   :  { %250 = dma.done.wait [#allocation4], 32  }
 0x244   :  { %251 = vsyncadd [#allocation4], 4294967264 }
 0x245   :  { %154 = vsyncpa [#allocation3], 1 }
 0x246   :  { %155 = vsyncpa [#allocation6], 1 }
 0x247   :  { %156 = vsyncpa [#allocation4], 1 }

</bundles_post_ra>
